<compile_context>
chip_gen: v7x
topology: tpu7x:2x2x1
jax: 0.10.0
libtpu: 0.0.40
codegen_flags: <defaults>
</compile_context>

<pallas_src>
import functools

import jax
import jax.numpy as jnp
import numpy as np
from jax.experimental import pallas as pl
from jax.experimental.pallas import tpu as pltpu


def _polygon_kernel(t_ref, sig_ref, xg_ref, yg_ref, i_ref, o_ref, *, H, W, C, nB):
    """One grid step == nB batch elements x one pixel tile of T output pixels."""
    nb = pl.program_id(0)
    T = xg_ref.shape[1]
    fW = float(W)
    fH = float(H)

    # Normalized base-grid coords of the output pixels in this tile (hoisted
    # grid-invariant precompute from the wrapper).
    xg = xg_ref[...]                                   # (1, T)
    yg = yg_ref[...]                                   # (1, T)

    # Source-index iotas on the sublane axis (built once per step, shared by
    # all nB batch elements).  int32 iota + convert is the safe lowering path.
    xi = jax.lax.broadcasted_iota(jnp.int32, (W, T), 0).astype(jnp.float32)
    yi = jax.lax.broadcasted_iota(jnp.int32, (H, T), 0).astype(jnp.float32)

    wx_blocks = []
    wy_blocks = []
    for b in range(nB):                                # static unroll, nB <= 8
        base = (nb * nB + b) * 6
        t00 = t_ref[base + 0]; t01 = t_ref[base + 1]; t02 = t_ref[base + 2]
        t10 = t_ref[base + 3]; t11 = t_ref[base + 4]; t12 = t_ref[base + 5]

        # Affine transform -> sampling coords, un-normalized (align_corners=False).
        xs = t00 * xg + t01 * yg + t02
        ys = t10 * xg + t11 * yg + t12
        ix = ((xs + 1.0) * fW - 1.0) * 0.5             # (1, T)
        iy = ((ys + 1.0) * fH - 1.0) * 0.5             # (1, T)

        # 'Hat' bilinear weights; out-of-range coords -> all-zero columns,
        # which reproduces grid_sample's zeros padding.
        wx_blocks.append(jnp.maximum(0.0, 1.0 - jnp.abs(xi - ix)))   # (W, T)
        wy_blocks.append(jnp.maximum(0.0, 1.0 - jnp.abs(yi - iy)))   # (H, T)

    # Stack per-batch Wx along the lane axis (T is a multiple of 128 when
    # nB > 1, so this is an aligned lane concat, no repacking).
    Wx = wx_blocks[0] if nB == 1 else jnp.concatenate(wx_blocks, axis=1)
    Wx = Wx.astype(jnp.bfloat16)                       # (W, nB*T)

    # x-interpolation for all (C+1) channels and all nB batch elements with a
    # single bf16 MXU matmul, f32 accumulate:
    #   ((C+1)*H, W) @ (W, nB*T) -> ((C+1)*H, nB*T)
    tx = jnp.dot(sig_ref[...], Wx, preferred_element_type=jnp.float32)

    # y-interpolation (weighted sublane reduce) + composite, per channel.
    for b in range(nB):
        Wy = wy_blocks[b]                              # (H, T), f32
        c0 = b * T
        alpha_s = jnp.sum(tx[0:H, c0:c0 + T] * Wy, axis=0, keepdims=True)   # (1, T)
        for c in range(C):
            r0 = (c + 1) * H                           # 8-aligned for H % 8 == 0
            trig_c = jnp.sum(tx[r0:r0 + H, c0:c0 + T] * Wy, axis=0, keepdims=True)
            img_c = i_ref[b, c:c + 1, :]               # (1, T)
            # out = (1-alpha)*I + alpha*T  ==  I + alpha*(T - I)
            o_ref[b, c:c + 1, :] = (img_c + alpha_s * (trig_c - img_c)).astype(o_ref.dtype)


def _largest_pixel_tile(HW, cap=2048):
    """Largest divisor of HW that is a multiple of 128 and <= cap (else HW).

    Cap chosen so per-step VMEM stays small on every generation (v7x has only
    64 MiB physical / 32 MiB scoped-default VMEM); re-derive if raising cap.
    """
    if HW <= cap:
        return HW
    t = (cap // 128) * 128
    while t >= 128:
        if HW % t == 0:
            return t
        t -= 128
    return HW


def _largest_batch_block(N, cap=8):
    b = min(N, cap)
    while N % b != 0:
        b -= 1
    return b


def polygon_forward(I, alpha_p, trig_p, transform, *, m,
                    pixel_tile_cap=2048, batch_block_cap=8):
    """I: (N,C,H,W); alpha_p: (1,1,H,W); trig_p: (1,C,H,W); transform: (N,6)."""
    N, C, H, W = I.shape
    HW = H * W
    # TODO(synk): optionally stream I / out in bf16 to halve HBM traffic once
    # the kernel is memory-bound; kept f32 here to match module output dtype.
    I_flat = I.reshape(N, C, HW).astype(jnp.float32)

    # Tiling: pixel tile T bounds per-step VMEM independent of image size;
    # batch block nB amortizes per-step overhead and fills the MXU RHS.
    T = _largest_pixel_tile(HW, pixel_tile_cap)
    nB = _largest_batch_block(N, batch_block_cap)
    if T % 128 != 0:
        nB = 1    # un-aligned lane concat would force repacking; skip batching
    n_bat = N // nB
    n_pix = HW // T

    # ---- grid-invariant precompute, hoisted out of the per-batch loop ----
    # Fused sigmoid source: row c*H + y, column x (c=0 alpha, c=1..C trigger),
    # stored bf16 as the MXU LHS.
    src = jnp.concatenate(
        [alpha_p.reshape(H, W), trig_p.reshape(C * H, W)], axis=0)
    sig = jax.nn.sigmoid(src.astype(jnp.float32) * float(m)).astype(jnp.bfloat16)

    # Normalized base grid coordinates, flattened row-major (p = i*W + j).
    jj = (2.0 * jnp.arange(W, dtype=jnp.float32) + 1.0) / W - 1.0
    ii = (2.0 * jnp.arange(H, dtype=jnp.float32) + 1.0) / H - 1.0
    xg = jnp.tile(jj, (H,)).reshape(1, HW)
    yg = jnp.repeat(ii, W).reshape(1, HW)

    t_flat = transform.reshape(-1).astype(jnp.float32)          # (N*6,) -> SMEM

    kernel = functools.partial(_polygon_kernel, H=H, W=W, C=C, nB=nB)

    flops = int(N * (2 * (C + 1) * H * W * HW       # x-interp matmul
                     + 3 * (C + 1) * H * HW         # y-interp weighted reduce
                     + 6 * (H + W) * HW             # hat-weight build
                     + 4 * C * HW))                 # composite
    bytes_accessed = int(4 * (N * 2 * C * HW + 2 * HW + N * 6)
                         + 2 * (C + 1) * H * W)

    out_flat = pl.pallas_call(
        kernel,
        out_shape=jax.ShapeDtypeStruct((N, C, HW), jnp.float32),
        grid=(n_bat, n_pix),
        in_specs=[
            pl.BlockSpec(memory_space=pltpu.MemorySpace.SMEM),        # transforms
            pl.BlockSpec(((C + 1) * H, W), lambda nb, pt: (0, 0)),    # sigmoid src
            pl.BlockSpec((1, T), lambda nb, pt: (0, pt)),             # base grid x
            pl.BlockSpec((1, T), lambda nb, pt: (0, pt)),             # base grid y
            pl.BlockSpec((nB, C, T), lambda nb, pt: (nb, 0, pt)),     # input image
        ],
        out_specs=pl.BlockSpec((nB, C, T), lambda nb, pt: (nb, 0, pt)),
        compiler_params=pltpu.CompilerParams(
            dimension_semantics=("parallel", "parallel")),            # v7x: 2 TCs
        cost_estimate=pl.CostEstimate(
            flops=flops, transcendentals=0, bytes_accessed=bytes_accessed),
    )(t_flat, sig, xg, yg, I_flat)

    return out_flat.reshape(N, C, H, W)


def make_transforms(key, N, s, theta, offset, aug=True):
    """Build the per-batch 2x3 affine transforms (flattened to (N, 6))."""
    if not aug:
        ident = jnp.array([1.0, 0.0, 0.0, 0.0, 1.0, 0.0], jnp.float32)
        return jnp.tile(ident[None, :], (N, 1))
    k1, k2, k3 = jax.random.split(key, 3)
    u_sz = jax.random.uniform(k1, (N,), minval=-0.2, maxval=0.2)
    u_th = jax.random.uniform(k2, (N,), minval=-3.14 / 6, maxval=3.14 / 6)
    u_off = jax.random.uniform(k3, (N, 2), minval=-0.3, maxval=0.3)
    sz = jnp.exp(u_sz - s[0])
    th = u_th + theta[0]
    off = u_off + offset[None, :]
    t = jnp.stack(
        [sz * jnp.cos(th), -sz * jnp.sin(th), off[:, 0],
         sz * jnp.sin(th), sz * jnp.cos(th), off[:, 1]],
        axis=1,
    )
    return t.astype(jnp.float32)


def reference_forward(I, alpha_p, trig_p, transform, m):
    """Pure-JAX reference: affine_grid + bilinear grid_sample (zeros padding)."""
    N, C, H, W = I.shape
    alpha = jax.nn.sigmoid(alpha_p * m)[0]  # (1, H, W)
    trig = jax.nn.sigmoid(trig_p * m)[0]    # (3, H, W)
    X = ((2.0 * jnp.arange(W) + 1.0) / W - 1.0)[None, :] * jnp.ones((H, 1))
    Y = ((2.0 * jnp.arange(H) + 1.0) / H - 1.0)[:, None] * jnp.ones((1, W))

    def sample_one(img, t):  # img (C', H, W)
        xs = t[0] * X + t[1] * Y + t[2]
        ys = t[3] * X + t[4] * Y + t[5]
        ix = ((xs + 1.0) * W - 1.0) / 2.0
        iy = ((ys + 1.0) * H - 1.0) / 2.0
        x0f = jnp.floor(ix); y0f = jnp.floor(iy)
        x0 = x0f.astype(jnp.int32); y0 = y0f.astype(jnp.int32)
        wx1 = ix - x0f; wx0 = 1.0 - wx1
        wy1 = iy - y0f; wy0 = 1.0 - wy1

        def g(yy, xx):
            valid = ((xx >= 0) & (xx < W) & (yy >= 0) & (yy < H)).astype(img.dtype)
            v = img[:, jnp.clip(yy, 0, H - 1), jnp.clip(xx, 0, W - 1)]
            return v * valid[None]

        return (g(y0, x0) * (wy0 * wx0)[None] + g(y0, x0 + 1) * (wy0 * wx1)[None]
                + g(y0 + 1, x0) * (wy1 * wx0)[None] + g(y0 + 1, x0 + 1) * (wy1 * wx1)[None])

    outs = []
    for n in range(N):
        a = sample_one(alpha, transform[n])   # (1, H, W)
        tr = sample_one(trig, transform[n])   # (3, H, W)
        outs.append((1.0 - a) * I[n] + a * tr)
    return jnp.stack(outs, axis=0)


if __name__ == "__main__":
    H = W = 16
    N, C = 2, 3
    m = 10
    alpha_bias = -0.1

    key = jax.random.PRNGKey(0)
    k_alpha, k_trig, k_I, k_aug = jax.random.split(key, 4)

    # Deterministic parameter init matching the module's __init__ shapes/dists.
    alpha_p = (jax.random.uniform(k_alpha, (1, 1, H, W), minval=-0.01, maxval=0.01)
               + alpha_bias).astype(jnp.float32)
    trig_p = jax.random.uniform(k_trig, (1, 3, H, W),
                                minval=-0.01, maxval=0.01).astype(jnp.float32)
    s = jnp.zeros((1,), jnp.float32)
    theta = jnp.zeros((1,), jnp.float32)
    offset = jnp.zeros((2,), jnp.float32)

    I = jax.random.uniform(k_I, (N, C, H, W), dtype=jnp.float32)

    # Random per-batch augmentation transforms (aug=True path).
    # TODO(synk): torch's in-forward RNG has no in-kernel equivalent; transforms
    # are built with jax.random glue in the wrapper (same distributions).
    transform = make_transforms(k_aug, N, s, theta, offset, aug=True)

    out = polygon_forward(I, alpha_p, trig_p, transform, m=m)
    jax.block_until_ready(out)

    ref = reference_forward(I, alpha_p, trig_p, transform, m)
    np.testing.assert_allclose(np.asarray(out), np.asarray(ref), atol=2e-2, rtol=2e-2)

    print("KERNEL_OK")
</pallas_src>

<mosaic_0001>
module attributes {stable_mosaic.version = 11 : i64} {
  func.func @_polygon_kernel(%arg0: i32, %arg1: i32, %arg2: memref<12xf32, #tpu.memory_space<smem>>, %arg3: memref<64x16xbf16, #tpu.memory_space<vmem>>, %arg4: memref<1x256xf32, #tpu.memory_space<vmem>>, %arg5: memref<1x256xf32, #tpu.memory_space<vmem>>, %arg6: memref<2x3x256xf32, #tpu.memory_space<vmem>>, %arg7: memref<2x3x256xf32, #tpu.memory_space<vmem>>) attributes {dimension_semantics = [#tpu.dimension_semantics<parallel>, #tpu.dimension_semantics<parallel>], iteration_bounds = array<i64: 1, 1>, scalar_prefetch = 0 : i64, scratch_operands = 0 : i64, tpu.core_type = #tpu.core_type<tc>, window_params = [{transform_indices = @transform_0, window_bounds = array<i64: 12>}, {pipeline_mode = #tpu.pipeline_mode<synchronous>, transform_indices = @transform_1, window_bounds = array<i64: 64, 16>}, {transform_indices = @transform_2, window_bounds = array<i64: 1, 256>}, {transform_indices = @transform_3, window_bounds = array<i64: 1, 256>}, {transform_indices = @transform_4, window_bounds = array<i64: 2, 3, 256>}, {transform_indices = @transform_5, window_bounds = array<i64: 2, 3, 256>}]} {
    %c0 = arith.constant 0 : index
    %c0_0 = arith.constant 0 : index
    %0 = vector.load %arg4[%c0, %c0_0] : memref<1x256xf32, #tpu.memory_space<vmem>>, vector<1x256xf32>
    %c0_1 = arith.constant 0 : index
    %c0_2 = arith.constant 0 : index
    %1 = vector.load %arg5[%c0_1, %c0_2] : memref<1x256xf32, #tpu.memory_space<vmem>>, vector<1x256xf32>
    %2 = tpu.iota {dimensions = array<i32: 0>} : vector<16x256xi32>
    %3 = arith.sitofp %2 : vector<16x256xi32> to vector<16x256xf32>
    %4 = tpu.iota {dimensions = array<i32: 0>} : vector<16x256xi32>
    %5 = arith.sitofp %4 : vector<16x256xi32> to vector<16x256xf32>
    %c2_i32 = arith.constant 2 : i32
    %6 = arith.muli %arg0, %c2_i32 : i32
    %c0_i32 = arith.constant 0 : i32
    %7 = arith.addi %6, %c0_i32 : i32
    %c6_i32 = arith.constant 6 : i32
    %8 = arith.muli %7, %c6_i32 : i32
    %c0_i32_3 = arith.constant 0 : i32
    %9 = arith.addi %8, %c0_i32_3 : i32
    %10 = arith.index_cast %9 : i32 to index
    %11 = memref.load %arg2[%10] : memref<12xf32, #tpu.memory_space<smem>>
    %c1_i32 = arith.constant 1 : i32
    %12 = arith.addi %8, %c1_i32 : i32
    %13 = arith.index_cast %12 : i32 to index
    %14 = memref.load %arg2[%13] : memref<12xf32, #tpu.memory_space<smem>>
    %c2_i32_4 = arith.constant 2 : i32
    %15 = arith.addi %8, %c2_i32_4 : i32
    %16 = arith.index_cast %15 : i32 to index
    %17 = memref.load %arg2[%16] : memref<12xf32, #tpu.memory_space<smem>>
    %c3_i32 = arith.constant 3 : i32
    %18 = arith.addi %8, %c3_i32 : i32
    %19 = arith.index_cast %18 : i32 to index
    %20 = memref.load %arg2[%19] : memref<12xf32, #tpu.memory_space<smem>>
    %c4_i32 = arith.constant 4 : i32
    %21 = arith.addi %8, %c4_i32 : i32
    %22 = arith.index_cast %21 : i32 to index
    %23 = memref.load %arg2[%22] : memref<12xf32, #tpu.memory_space<smem>>
    %c5_i32 = arith.constant 5 : i32
    %24 = arith.addi %8, %c5_i32 : i32
    %25 = arith.index_cast %24 : i32 to index
    %26 = memref.load %arg2[%25] : memref<12xf32, #tpu.memory_space<smem>>
    %27 = vector.broadcast %11 : f32 to vector<1x256xf32>
    %28 = arith.mulf %27, %0 : vector<1x256xf32>
    %29 = vector.broadcast %14 : f32 to vector<1x256xf32>
    %30 = arith.mulf %29, %1 : vector<1x256xf32>
    %31 = arith.addf %28, %30 : vector<1x256xf32>
    %32 = vector.broadcast %17 : f32 to vector<1x256xf32>
    %33 = arith.addf %31, %32 : vector<1x256xf32>
    %34 = vector.broadcast %20 : f32 to vector<1x256xf32>
    %35 = arith.mulf %34, %0 : vector<1x256xf32>
    %36 = vector.broadcast %23 : f32 to vector<1x256xf32>
    %37 = arith.mulf %36, %1 : vector<1x256xf32>
    %38 = arith.addf %35, %37 : vector<1x256xf32>
    %39 = vector.broadcast %26 : f32 to vector<1x256xf32>
    %40 = arith.addf %38, %39 : vector<1x256xf32>
    %cst = arith.constant 1.000000e+00 : f32
    %41 = vector.broadcast %cst : f32 to vector<1x256xf32>
    %42 = arith.addf %33, %41 : vector<1x256xf32>
    %cst_5 = arith.constant 1.600000e+01 : f32
    %43 = vector.broadcast %cst_5 : f32 to vector<1x256xf32>
    %44 = arith.mulf %42, %43 : vector<1x256xf32>
    %cst_6 = arith.constant 1.000000e+00 : f32
    %45 = vector.broadcast %cst_6 : f32 to vector<1x256xf32>
    %46 = arith.subf %44, %45 : vector<1x256xf32>
    %cst_7 = arith.constant 5.000000e-01 : f32
    %47 = vector.broadcast %cst_7 : f32 to vector<1x256xf32>
    %48 = arith.mulf %46, %47 : vector<1x256xf32>
    %cst_8 = arith.constant 1.000000e+00 : f32
    %49 = vector.broadcast %cst_8 : f32 to vector<1x256xf32>
    %50 = arith.addf %40, %49 : vector<1x256xf32>
    %cst_9 = arith.constant 1.600000e+01 : f32
    %51 = vector.broadcast %cst_9 : f32 to vector<1x256xf32>
    %52 = arith.mulf %50, %51 : vector<1x256xf32>
    %cst_10 = arith.constant 1.000000e+00 : f32
    %53 = vector.broadcast %cst_10 : f32 to vector<1x256xf32>
    %54 = arith.subf %52, %53 : vector<1x256xf32>
    %cst_11 = arith.constant 5.000000e-01 : f32
    %55 = vector.broadcast %cst_11 : f32 to vector<1x256xf32>
    %56 = arith.mulf %54, %55 : vector<1x256xf32>
    %57 = vector.broadcast %48 : vector<1x256xf32> to vector<16x256xf32>
    %58 = arith.subf %3, %57 : vector<16x256xf32>
    %59 = math.absf %58 : vector<16x256xf32>
    %cst_12 = arith.constant 1.000000e+00 : f32
    %60 = vector.broadcast %cst_12 : f32 to vector<16x256xf32>
    %61 = arith.subf %60, %59 : vector<16x256xf32>
    %cst_13 = arith.constant 0.000000e+00 : f32
    %62 = vector.broadcast %cst_13 : f32 to vector<16x256xf32>
    %63 = arith.maximumf %62, %61 : vector<16x256xf32>
    %64 = vector.broadcast %56 : vector<1x256xf32> to vector<16x256xf32>
    %65 = arith.subf %5, %64 : vector<16x256xf32>
    %66 = math.absf %65 : vector<16x256xf32>
    %cst_14 = arith.constant 1.000000e+00 : f32
    %67 = vector.broadcast %cst_14 : f32 to vector<16x256xf32>
    %68 = arith.subf %67, %66 : vector<16x256xf32>
    %cst_15 = arith.constant 0.000000e+00 : f32
    %69 = vector.broadcast %cst_15 : f32 to vector<16x256xf32>
    %70 = arith.maximumf %69, %68 : vector<16x256xf32>
    %c2_i32_16 = arith.constant 2 : i32
    %71 = arith.muli %arg0, %c2_i32_16 : i32
    %c1_i32_17 = arith.constant 1 : i32
    %72 = arith.addi %71, %c1_i32_17 : i32
    %c6_i32_18 = arith.constant 6 : i32
    %73 = arith.muli %72, %c6_i32_18 : i32
    %c0_i32_19 = arith.constant 0 : i32
    %74 = arith.addi %73, %c0_i32_19 : i32
    %75 = arith.index_cast %74 : i32 to index
    %76 = memref.load %arg2[%75] : memref<12xf32, #tpu.memory_space<smem>>
    %c1_i32_20 = arith.constant 1 : i32
    %77 = arith.addi %73, %c1_i32_20 : i32
    %78 = arith.index_cast %77 : i32 to index
    %79 = memref.load %arg2[%78] : memref<12xf32, #tpu.memory_space<smem>>
    %c2_i32_21 = arith.constant 2 : i32
    %80 = arith.addi %73, %c2_i32_21 : i32
    %81 = arith.index_cast %80 : i32 to index
    %82 = memref.load %arg2[%81] : memref<12xf32, #tpu.memory_space<smem>>
    %c3_i32_22 = arith.constant 3 : i32
    %83 = arith.addi %73, %c3_i32_22 : i32
    %84 = arith.index_cast %83 : i32 to index
    %85 = memref.load %arg2[%84] : memref<12xf32, #tpu.memory_space<smem>>
    %c4_i32_23 = arith.constant 4 : i32
    %86 = arith.addi %73, %c4_i32_23 : i32
    %87 = arith.index_cast %86 : i32 to index
    %88 = memref.load %arg2[%87] : memref<12xf32, #tpu.memory_space<smem>>
    %c5_i32_24 = arith.constant 5 : i32
    %89 = arith.addi %73, %c5_i32_24 : i32
    %90 = arith.index_cast %89 : i32 to index
    %91 = memref.load %arg2[%90] : memref<12xf32, #tpu.memory_space<smem>>
    %92 = vector.broadcast %76 : f32 to vector<1x256xf32>
    %93 = arith.mulf %92, %0 : vector<1x256xf32>
    %94 = vector.broadcast %79 : f32 to vector<1x256xf32>
    %95 = arith.mulf %94, %1 : vector<1x256xf32>
    %96 = arith.addf %93, %95 : vector<1x256xf32>
    %97 = vector.broadcast %82 : f32 to vector<1x256xf32>
    %98 = arith.addf %96, %97 : vector<1x256xf32>
    %99 = vector.broadcast %85 : f32 to vector<1x256xf32>
    %100 = arith.mulf %99, %0 : vector<1x256xf32>
    %101 = vector.broadcast %88 : f32 to vector<1x256xf32>
    %102 = arith.mulf %101, %1 : vector<1x256xf32>
    %103 = arith.addf %100, %102 : vector<1x256xf32>
    %104 = vector.broadcast %91 : f32 to vector<1x256xf32>
    %105 = arith.addf %103, %104 : vector<1x256xf32>
    %cst_25 = arith.constant 1.000000e+00 : f32
    %106 = vector.broadcast %cst_25 : f32 to vector<1x256xf32>
    %107 = arith.addf %98, %106 : vector<1x256xf32>
    %cst_26 = arith.constant 1.600000e+01 : f32
    %108 = vector.broadcast %cst_26 : f32 to vector<1x256xf32>
    %109 = arith.mulf %107, %108 : vector<1x256xf32>
    %cst_27 = arith.constant 1.000000e+00 : f32
    %110 = vector.broadcast %cst_27 : f32 to vector<1x256xf32>
    %111 = arith.subf %109, %110 : vector<1x256xf32>
    %cst_28 = arith.constant 5.000000e-01 : f32
    %112 = vector.broadcast %cst_28 : f32 to vector<1x256xf32>
    %113 = arith.mulf %111, %112 : vector<1x256xf32>
    %cst_29 = arith.constant 1.000000e+00 : f32
    %114 = vector.broadcast %cst_29 : f32 to vector<1x256xf32>
    %115 = arith.addf %105, %114 : vector<1x256xf32>
    %cst_30 = arith.constant 1.600000e+01 : f32
    %116 = vector.broadcast %cst_30 : f32 to vector<1x256xf32>
    %117 = arith.mulf %115, %116 : vector<1x256xf32>
    %cst_31 = arith.constant 1.000000e+00 : f32
    %118 = vector.broadcast %cst_31 : f32 to vector<1x256xf32>
    %119 = arith.subf %117, %118 : vector<1x256xf32>
    %cst_32 = arith.constant 5.000000e-01 : f32
    %120 = vector.broadcast %cst_32 : f32 to vector<1x256xf32>
    %121 = arith.mulf %119, %120 : vector<1x256xf32>
    %122 = vector.broadcast %113 : vector<1x256xf32> to vector<16x256xf32>
    %123 = arith.subf %3, %122 : vector<16x256xf32>
    %124 = math.absf %123 : vector<16x256xf32>
    %cst_33 = arith.constant 1.000000e+00 : f32
    %125 = vector.broadcast %cst_33 : f32 to vector<16x256xf32>
    %126 = arith.subf %125, %124 : vector<16x256xf32>
    %cst_34 = arith.constant 0.000000e+00 : f32
    %127 = vector.broadcast %cst_34 : f32 to vector<16x256xf32>
    %128 = arith.maximumf %127, %126 : vector<16x256xf32>
    %129 = vector.broadcast %121 : vector<1x256xf32> to vector<16x256xf32>
    %130 = arith.subf %5, %129 : vector<16x256xf32>
    %131 = math.absf %130 : vector<16x256xf32>
    %cst_35 = arith.constant 1.000000e+00 : f32
    %132 = vector.broadcast %cst_35 : f32 to vector<16x256xf32>
    %133 = arith.subf %132, %131 : vector<16x256xf32>
    %cst_36 = arith.constant 0.000000e+00 : f32
    %134 = vector.broadcast %cst_36 : f32 to vector<16x256xf32>
    %135 = arith.maximumf %134, %133 : vector<16x256xf32>
    %136 = tpu.concatenate %63, %128 in 1 : vector<16x256xf32>, vector<16x256xf32> -> vector<16x512xf32>
    %137 = arith.truncf %136 : vector<16x512xf32> to vector<16x512xbf16>
    %c0_37 = arith.constant 0 : index
    %c0_38 = arith.constant 0 : index
    %138 = vector.load %arg3[%c0_37, %c0_38] : memref<64x16xbf16, #tpu.memory_space<vmem>>, vector<64x16xbf16>
    %cst_39 = arith.constant dense<0.000000e+00> : vector<64x512xf32>
    %139 = tpu.matmul %138, %137, %cst_39 {dimension_numbers = #tpu.dot_dimension_numbers<[1], [0], [0], [1], [0, 0, 1, 1], [], []>} : vector<64x16xbf16>, vector<16x512xbf16>, vector<64x512xf32> -> vector<64x512xf32>
    %140 = vector.extract_strided_slice %139 {offsets = [0, 0], sizes = [16, 256], strides = [1, 1]} : vector<64x512xf32> to vector<16x256xf32>
    %141 = arith.mulf %140, %70 : vector<16x256xf32>
    %cst_40 = arith.constant dense<0.000000e+00> : vector<256xf32>
    %142 = vector.multi_reduction <add>, %141, %cst_40 [0] : vector<16x256xf32> to vector<256xf32>
    %143 = vector.shape_cast %142 : vector<256xf32> to vector<1x256xf32>
    %144 = vector.extract_strided_slice %139 {offsets = [16, 0], sizes = [16, 256], strides = [1, 1]} : vector<64x512xf32> to vector<16x256xf32>
    %145 = arith.mulf %144, %70 : vector<16x256xf32>
    %cst_41 = arith.constant dense<0.000000e+00> : vector<256xf32>
    %146 = vector.multi_reduction <add>, %145, %cst_41 [0] : vector<16x256xf32> to vector<256xf32>
    %147 = vector.shape_cast %146 : vector<256xf32> to vector<1x256xf32>
    %c0_42 = arith.constant 0 : index
    %c0_43 = arith.constant 0 : index
    %c0_44 = arith.constant 0 : index
    %148 = vector.load %arg6[%c0_42, %c0_43, %c0_44] : memref<2x3x256xf32, #tpu.memory_space<vmem>>, vector<1x1x256xf32>
    %149 = vector.shape_cast %148 : vector<1x1x256xf32> to vector<1x256xf32>
    %150 = arith.subf %147, %149 : vector<1x256xf32>
    %151 = arith.mulf %143, %150 : vector<1x256xf32>
    %152 = arith.addf %149, %151 : vector<1x256xf32>
    %c0_45 = arith.constant 0 : index
    %c0_46 = arith.constant 0 : index
    %c0_47 = arith.constant 0 : index
    %153 = vector.load %arg7[%c0_45, %c0_46, %c0_47] : memref<2x3x256xf32, #tpu.memory_space<vmem>>, vector<1x1x256xf32>
    %154 = vector.shape_cast %153 : vector<1x1x256xf32> to vector<1x256xf32>
    %155 = vector.shape_cast %152 : vector<1x256xf32> to vector<1x1x256xf32>
    tpu.vector_store %arg7[%c0_45, %c0_46, %c0_47], %155 {strides = array<i32>} : memref<2x3x256xf32, #tpu.memory_space<vmem>>, vector<1x1x256xf32>,
    %156 = vector.extract_strided_slice %139 {offsets = [32, 0], sizes = [16, 256], strides = [1, 1]} : vector<64x512xf32> to vector<16x256xf32>
    %157 = arith.mulf %156, %70 : vector<16x256xf32>
    %cst_48 = arith.constant dense<0.000000e+00> : vector<256xf32>
    %158 = vector.multi_reduction <add>, %157, %cst_48 [0] : vector<16x256xf32> to vector<256xf32>
    %159 = vector.shape_cast %158 : vector<256xf32> to vector<1x256xf32>
    %c0_49 = arith.constant 0 : index
    %c1 = arith.constant 1 : index
    %c0_50 = arith.constant 0 : index
    %160 = vector.load %arg6[%c0_49, %c1, %c0_50] : memref<2x3x256xf32, #tpu.memory_space<vmem>>, vector<1x1x256xf32>
    %161 = vector.shape_cast %160 : vector<1x1x256xf32> to vector<1x256xf32>
    %162 = arith.subf %159, %161 : vector<1x256xf32>
    %163 = arith.mulf %143, %162 : vector<1x256xf32>
    %164 = arith.addf %161, %163 : vector<1x256xf32>
    %c0_51 = arith.constant 0 : index
    %c1_52 = arith.constant 1 : index
    %c0_53 = arith.constant 0 : index
    %165 = vector.load %arg7[%c0_51, %c1_52, %c0_53] : memref<2x3x256xf32, #tpu.memory_space<vmem>>, vector<1x1x256xf32>
    %166 = vector.shape_cast %165 : vector<1x1x256xf32> to vector<1x256xf32>
    %167 = vector.shape_cast %164 : vector<1x256xf32> to vector<1x1x256xf32>
    tpu.vector_store %arg7[%c0_51, %c1_52, %c0_53], %167 {strides = array<i32>} : memref<2x3x256xf32, #tpu.memory_space<vmem>>, vector<1x1x256xf32>,
    %168 = vector.extract_strided_slice %139 {offsets = [48, 0], sizes = [16, 256], strides = [1, 1]} : vector<64x512xf32> to vector<16x256xf32>
    %169 = arith.mulf %168, %70 : vector<16x256xf32>
    %cst_54 = arith.constant dense<0.000000e+00> : vector<256xf32>
    %170 = vector.multi_reduction <add>, %169, %cst_54 [0] : vector<16x256xf32> to vector<256xf32>
    %171 = vector.shape_cast %170 : vector<256xf32> to vector<1x256xf32>
    %c0_55 = arith.constant 0 : index
    %c2 = arith.constant 2 : index
    %c0_56 = arith.constant 0 : index
    %172 = vector.load %arg6[%c0_55, %c2, %c0_56] : memref<2x3x256xf32, #tpu.memory_space<vmem>>, vector<1x1x256xf32>
    %173 = vector.shape_cast %172 : vector<1x1x256xf32> to vector<1x256xf32>
    %174 = arith.subf %171, %173 : vector<1x256xf32>
    %175 = arith.mulf %143, %174 : vector<1x256xf32>
    %176 = arith.addf %173, %175 : vector<1x256xf32>
    %c0_57 = arith.constant 0 : index
    %c2_58 = arith.constant 2 : index
    %c0_59 = arith.constant 0 : index
    %177 = vector.load %arg7[%c0_57, %c2_58, %c0_59] : memref<2x3x256xf32, #tpu.memory_space<vmem>>, vector<1x1x256xf32>
    %178 = vector.shape_cast %177 : vector<1x1x256xf32> to vector<1x256xf32>
    %179 = vector.shape_cast %176 : vector<1x256xf32> to vector<1x1x256xf32>
    tpu.vector_store %arg7[%c0_57, %c2_58, %c0_59], %179 {strides = array<i32>} : memref<2x3x256xf32, #tpu.memory_space<vmem>>, vector<1x1x256xf32>,
    %180 = vector.extract_strided_slice %139 {offsets = [0, 256], sizes = [16, 256], strides = [1, 1]} : vector<64x512xf32> to vector<16x256xf32>
    %181 = arith.mulf %180, %135 : vector<16x256xf32>
    %cst_60 = arith.constant dense<0.000000e+00> : vector<256xf32>
    %182 = vector.multi_reduction <add>, %181, %cst_60 [0] : vector<16x256xf32> to vector<256xf32>
    %183 = vector.shape_cast %182 : vector<256xf32> to vector<1x256xf32>
    %184 = vector.extract_strided_slice %139 {offsets = [16, 256], sizes = [16, 256], strides = [1, 1]} : vector<64x512xf32> to vector<16x256xf32>
    %185 = arith.mulf %184, %135 : vector<16x256xf32>
    %cst_61 = arith.constant dense<0.000000e+00> : vector<256xf32>
    %186 = vector.multi_reduction <add>, %185, %cst_61 [0] : vector<16x256xf32> to vector<256xf32>
    %187 = vector.shape_cast %186 : vector<256xf32> to vector<1x256xf32>
    %c1_62 = arith.constant 1 : index
    %c0_63 = arith.constant 0 : index
    %c0_64 = arith.constant 0 : index
    %188 = vector.load %arg6[%c1_62, %c0_63, %c0_64] : memref<2x3x256xf32, #tpu.memory_space<vmem>>, vector<1x1x256xf32>
    %189 = vector.shape_cast %188 : vector<1x1x256xf32> to vector<1x256xf32>
    %190 = arith.subf %187, %189 : vector<1x256xf32>
    %191 = arith.mulf %183, %190 : vector<1x256xf32>
    %192 = arith.addf %189, %191 : vector<1x256xf32>
    %c1_65 = arith.constant 1 : index
    %c0_66 = arith.constant 0 : index
    %c0_67 = arith.constant 0 : index
    %193 = vector.load %arg7[%c1_65, %c0_66, %c0_67] : memref<2x3x256xf32, #tpu.memory_space<vmem>>, vector<1x1x256xf32>
    %194 = vector.shape_cast %193 : vector<1x1x256xf32> to vector<1x256xf32>
    %195 = vector.shape_cast %192 : vector<1x256xf32> to vector<1x1x256xf32>
    tpu.vector_store %arg7[%c1_65, %c0_66, %c0_67], %195 {strides = array<i32>} : memref<2x3x256xf32, #tpu.memory_space<vmem>>, vector<1x1x256xf32>,
    %196 = vector.extract_strided_slice %139 {offsets = [32, 256], sizes = [16, 256], strides = [1, 1]} : vector<64x512xf32> to vector<16x256xf32>
    %197 = arith.mulf %196, %135 : vector<16x256xf32>
    %cst_68 = arith.constant dense<0.000000e+00> : vector<256xf32>
    %198 = vector.multi_reduction <add>, %197, %cst_68 [0] : vector<16x256xf32> to vector<256xf32>
    %199 = vector.shape_cast %198 : vector<256xf32> to vector<1x256xf32>
    %c1_69 = arith.constant 1 : index
    %c1_70 = arith.constant 1 : index
    %c0_71 = arith.constant 0 : index
    %200 = vector.load %arg6[%c1_69, %c1_70, %c0_71] : memref<2x3x256xf32, #tpu.memory_space<vmem>>, vector<1x1x256xf32>
    %201 = vector.shape_cast %200 : vector<1x1x256xf32> to vector<1x256xf32>
    %202 = arith.subf %199, %201 : vector<1x256xf32>
    %203 = arith.mulf %183, %202 : vector<1x256xf32>
    %204 = arith.addf %201, %203 : vector<1x256xf32>
    %c1_72 = arith.constant 1 : index
    %c1_73 = arith.constant 1 : index
    %c0_74 = arith.constant 0 : index
    %205 = vector.load %arg7[%c1_72, %c1_73, %c0_74] : memref<2x3x256xf32, #tpu.memory_space<vmem>>, vector<1x1x256xf32>
    %206 = vector.shape_cast %205 : vector<1x1x256xf32> to vector<1x256xf32>
    %207 = vector.shape_cast %204 : vector<1x256xf32> to vector<1x1x256xf32>
    tpu.vector_store %arg7[%c1_72, %c1_73, %c0_74], %207 {strides = array<i32>} : memref<2x3x256xf32, #tpu.memory_space<vmem>>, vector<1x1x256xf32>,
    %208 = vector.extract_strided_slice %139 {offsets = [48, 256], sizes = [16, 256], strides = [1, 1]} : vector<64x512xf32> to vector<16x256xf32>
    %209 = arith.mulf %208, %135 : vector<16x256xf32>
    %cst_75 = arith.constant dense<0.000000e+00> : vector<256xf32>
    %210 = vector.multi_reduction <add>, %209, %cst_75 [0] : vector<16x256xf32> to vector<256xf32>
    %211 = vector.shape_cast %210 : vector<256xf32> to vector<1x256xf32>
    %c1_76 = arith.constant 1 : index
    %c2_77 = arith.constant 2 : index
    %c0_78 = arith.constant 0 : index
    %212 = vector.load %arg6[%c1_76, %c2_77, %c0_78] : memref<2x3x256xf32, #tpu.memory_space<vmem>>, vector<1x1x256xf32>
    %213 = vector.shape_cast %212 : vector<1x1x256xf32> to vector<1x256xf32>
    %214 = arith.subf %211, %213 : vector<1x256xf32>
    %215 = arith.mulf %183, %214 : vector<1x256xf32>
    %216 = arith.addf %213, %215 : vector<1x256xf32>
    %c1_79 = arith.constant 1 : index
    %c2_80 = arith.constant 2 : index
    %c0_81 = arith.constant 0 : index
    %217 = vector.load %arg7[%c1_79, %c2_80, %c0_81] : memref<2x3x256xf32, #tpu.memory_space<vmem>>, vector<1x1x256xf32>
    %218 = vector.shape_cast %217 : vector<1x1x256xf32> to vector<1x256xf32>
    %219 = vector.shape_cast %216 : vector<1x256xf32> to vector<1x1x256xf32>
    tpu.vector_store %arg7[%c1_79, %c2_80, %c0_81], %219 {strides = array<i32>} : memref<2x3x256xf32, #tpu.memory_space<vmem>>, vector<1x1x256xf32>,
    return
  }
  func.func @transform_0(%arg0: i32, %arg1: i32) -> i32 {
    %c0_i32 = arith.constant 0 : i32
    %c0_i32_0 = arith.constant 0 : i32
    return %c0_i32 : i32
  }
  func.func @transform_1(%arg0: i32, %arg1: i32) -> (i32, i32) {
    %c0_i32 = arith.constant 0 : i32
    %c0_i32_0 = arith.constant 0 : i32
    %c0_i32_1 = arith.constant 0 : i32
    return %c0_i32, %c0_i32_0 : i32, i32
  }
  func.func @transform_2(%arg0: i32, %arg1: i32) -> (i32, i32) {
    %c0_i32 = arith.constant 0 : i32
    %c0_i32_0 = arith.constant 0 : i32
    return %c0_i32, %arg1 : i32, i32
  }
  func.func @transform_3(%arg0: i32, %arg1: i32) -> (i32, i32) {
    %c0_i32 = arith.constant 0 : i32
    %c0_i32_0 = arith.constant 0 : i32
    return %c0_i32, %arg1 : i32, i32
  }
  func.func @transform_4(%arg0: i32, %arg1: i32) -> (i32, i32, i32) {
    %c0_i32 = arith.constant 0 : i32
    %c0_i32_0 = arith.constant 0 : i32
    return %arg0, %c0_i32, %arg1 : i32, i32, i32
  }
  func.func @transform_5(%arg0: i32, %arg1: i32) -> (i32, i32, i32) {
    %c0_i32 = arith.constant 0 : i32
    %c0_i32_0 = arith.constant 0 : i32
    return %arg0, %c0_i32, %arg1 : i32, i32, i32
  }
}

</mosaic_0001>

<bundles_post_ra>
// kernel: tpu_custom_call.1
= control target key start
LH: loop header
LB: loop body
LE: loop exit
PB: predicated region body
PF: predicated region fallthrough
CT: control target
= control target key end

     0   :  { %10 = vsyncpa [#allocation3], 0  ;;  %s1164_s0 = inlined_call_operand.vmem [shape: f32[12], index: 0, kind: input, shape index: {}]   ;;  %s1165_s1 = inlined_call_operand.vmem [shape: bf16[64,16], index: 1, kind: input, shape index: {}]   ;;  %s1166_s2 = inlined_call_operand.vmem [shape: f32[1,256], index: 2, kind: input, shape index: {}]   ;;  %s1167_s3 = inlined_call_operand.vmem [shape: f32[1,256], index: 3, kind: input, shape index: {}]   ;;  %s1168_s4 = inlined_call_operand.vmem [shape: f32[2,3,256], index: 4, kind: input, shape index: {}]   ;;  %s1169_s5 = inlined_call_operand.vmem [shape: f32[2,3,256], index: 5, kind: output, shape index: {}]  }
   0x1   :  { %s17_s20 = sshll.u32 %s1164_s0, 4  ;;  %s18_s20 = int_to_ptr.vmem [resolvable:$true] %s17_s20 }
   0x2   :  { %s837_s21 = scalar_lea.vmem %s18_s20, 16  ;;  %p842_p1 = scmp.lt.s32.totalorder %s18_s20, %s18_s20 }
   0x3   :  { %p838_p0 = scmp.ne.s32.totalorder %s18_s20, %s837_s21  ;;  %p843_p2 = scmp.lt.s32.totalorder %s837_s21, %s837_s21 }
   0x5   :  { %p844_p3 = por %p843_p2, %p842_p1 }
   0x7   :  { %p845_p4 = pnand %p844_p3, %p838_p0 }
   0x9   :  { %848 = shalt.err (!%p845_p4)
}
   0xa   :  { %s851_s22 = smov [#allocation2]  }
   0xb   :  { %20 = dma.vmem_to_smem %s18_s20, 16, %s851_s22, [#allocation3]  }
   0xc   :  { %849 = dma.done.wait [#allocation3], 16  }
   0xd   :  { %850 = vsyncadd [#allocation3], 4294967280 }
   0xe   :  { %32 = sfence }
   0xf   :  { %s42_s23 = sld [smem:[#allocation2]]  ;;  %s793_s24 = sld [smem:[#allocation2 + $0x1]]  ;;  %v852_v0 = vmov 0   ;;  %v892_v1 = vld [vmem:[%s1166_s2] sm:$0x3]  ;;  %v36_v6 = vlaneseq  ;;  %vm251_vm0 = vcmask 130048  }
  0x10   :  { %s794_s25 = sld [smem:[#allocation2 + $0x2]]  ;;  %s800_s26 = sld [smem:[#allocation2 + $0x6]]  ;;  %296 = vmatprep.mubr.bf16.mxu0 %v852_v0  ;;  %369 = vmatprep.mubr.bf16.mxu1 %v852_v0  ;;  %v897_v2 = vld [vmem:[%s1167_s3] sm:$0x3] }
  0x11   :  { %s801_s27 = sld [smem:[#allocation2 + $0x7]]  ;;  %s802_s28 = sld [smem:[#allocation2 + $0x8]]  ;;  %v904_v16 = vshrl.u32 %v36_v6, 7  ;;  %vm1075_vm1 = vcmp.lt.s32.totalorder %v36_v6, 256 }
  0x12   :  { %s795_s13 = sld [smem:[#allocation2 + $0x3]]  ;;  %s796_s14 = sld [smem:[#allocation2 + $0x4]] }
  0x13   :  { %v38_v21 = vadd.s32 8, %v904_v16  ;;  %v908_v25 = vsub.s32 1, %v904_v16  ;;  %v911_v26 = vsub.s32 0, %v904_v16  ;;  %v914_v28 = vcvt.s32.f32 %v904_v16  ;;  %s803_s15 = sld [smem:[#allocation2 + $0x9]]  ;;  %s804_s16 = sld [smem:[#allocation2 + $0xa]] }
  0x14   :  { %s797_s17 = sld [smem:[#allocation2 + $0x5]]  ;;  %s805_s18 = sld [smem:[#allocation2 + $0xb]] }
  0x15   :  { %v53_v3 = vstv %s42_s23  ;;  %v55_v5 = vstv %s793_s24  ;;  %v916_v29 = vcvt.s32.f32 %v38_v21 }
  0x16   :  { %v54_v4 = vmul.f32 %v53_v3, %v892_v1  ;;  %v56_v7 = vmul.f32 %v55_v5, %v897_v2  ;;  %v143_v8 = vstv %s800_s26  ;;  %v58_v10 = vstv %s794_s25 }
  0x17   :  { %v145_v9 = vstv %s801_s27  ;;  %v144_v11 = vmul.f32 %v143_v8, %v892_v1  ;;  %v148_v14 = vstv %s802_s28 }
  0x18   :  { %v146_v12 = vmul.f32 %v145_v9, %v897_v2  ;;  %v57_v13 = vadd.f32 %v56_v7, %v54_v4 }
  0x1a   :  { %v147_v15 = vadd.f32 %v146_v12, %v144_v11  ;;  %v59_v17 = vadd.f32 %v58_v10, %v57_v13  ;;  %v833_v11 = vld [vmem:[%s1165_s1] sm:$0xff]   ;;  %v834_v13 = vld [vmem:[%s1165_s1 + $0x8] sm:$0xff]  }
  0x1c   :  { %v149_v18 = vadd.f32 %v148_v14, %v147_v15  ;;  %v67_v19 = vadd.f32 1.0, %v59_v17  ;;  %v835_v14 = vld [vmem:[%s1165_s1 + $0x10] sm:$0xff]   ;;  %v836_v15 = vld [vmem:[%s1165_s1 + $0x18] sm:$0xff]   ;;  %v60_v17 = vstv %s795_s13 }
  0x1e   :  { %v157_v20 = vadd.f32 1.0, %v149_v18  ;;  %v68_v22 = vmul.f32 16.0, %v67_v19  ;;  %v62_v18 = vstv %s796_s14  ;;  %v150_v19 = vstv %s803_s15 }
  0x1f   :  { %v63_v21 = vmul.f32 %v62_v18, %v897_v2 }
  0x20   :  { %v158_v23 = vmul.f32 16.0, %v157_v20  ;;  %v798_v24 = vadd.f32 -1.0, %v68_v22  ;;  %v152_v20 = vstv %s804_s16  ;;  %v151_v22 = vmul.f32 %v150_v19, %v892_v1 }
  0x22   :  { %v806_v27 = vadd.f32 -1.0, %v158_v23  ;;  %v70_v30 = vmul.f32 0.5, %v798_v24  ;;  %v153_v23 = vmul.f32 %v152_v20, %v897_v2 }
  0x24   :  { %v160_v31 = vmul.f32 0.5, %v806_v27  ;;  %v83_v32 = vrot.slane %v70_v30, %v908_v25  ;;  %v79_v33 = vrot.slane %v70_v30, %v911_v26  ;;  %v65_v27 = vstv %s797_s17 }
  0x25   :  { %v154_v30 = vadd.f32 %v153_v23, %v151_v22 }
  0x26   :  { %v173_v34 = vrot.slane %v160_v31, %v908_v25  ;;  %v169_v35 = vrot.slane %v160_v31, %v911_v26  ;;  %v87_v36 = vsub.f32 %v914_v28, %v83_v32  ;;  %v89_v37 = vsub.f32 %v916_v29, %v83_v32 }
  0x27   :  { %v86_v38 = vsub.f32 %v914_v28, %v79_v33  ;;  %v88_v39 = vsub.f32 %v916_v29, %v79_v33  ;;  %v155_v31 = vstv %s805_s18 }
  0x28   :  { %v177_v40 = vsub.f32 %v914_v28, %v173_v34  ;;  %v179_v41 = vsub.f32 %v916_v29, %v173_v34  ;;  %v176_v42 = vsub.f32 %v914_v28, %v169_v35  ;;  %v178_v43 = vsub.f32 %v916_v29, %v169_v35 }
  0x29   :  { %v91_v44 = vand.u32 2147483647, %v87_v36  ;;  %v93_v45 = vand.u32 2147483647, %v89_v37  ;;  %v90_v46 = vand.u32 2147483647, %v86_v38  ;;  %v156_v33 = vadd.f32 %v155_v31, %v154_v30 }
  0x2a   :  { %v181_v47 = vand.u32 2147483647, %v177_v40  ;;  %v183_v48 = vand.u32 2147483647, %v179_v41  ;;  %v92_v49 = vand.u32 2147483647, %v88_v39 }
  0x2b   :  { %v95_v50 = vsub.f32 1.0, %v91_v44  ;;  %v97_v51 = vsub.f32 1.0, %v93_v45  ;;  %v94_v52 = vsub.f32 1.0, %v90_v46  ;;  %v180_v53 = vand.u32 2147483647, %v176_v42 }
  0x2c   :  { %v185_v54 = vsub.f32 1.0, %v181_v47  ;;  %v187_v55 = vsub.f32 1.0, %v183_v48  ;;  %v96_v56 = vsub.f32 1.0, %v92_v49  ;;  %v182_v57 = vand.u32 2147483647, %v178_v43 }
  0x2d   :  { %v99_v58 = vmax.f32 %v95_v50, 0.0  ;;  %v101_v59 = vmax.f32 %v97_v51, 0.0  ;;  %v98_v60 = vmax.f32 %v94_v52, 0.0  ;;  %v184_v61 = vsub.f32 1.0, %v180_v53 }
  0x2e   :  { %v189_v62 = vmax.f32 %v185_v54, 0.0  ;;  %v191_v63 = vmax.f32 %v187_v55, 0.0  ;;  %v100_v3 = vmax.f32 %v96_v56, 0.0  ;;  %v186_v4 = vsub.f32 1.0, %v182_v57 }
  0x2f   :  { %v220_v5 = vpack.c.bf16 %v101_v59, %v99_v58  ;;  %v188_v7 = vmax.f32 %v184_v61, 0.0  ;;  %v161_v35 = vadd.f32 1.0, %v156_v33  ;;  %v998_v30 = vld [vmem:[%s1168_s4 + $0x8] ss:$4 sm:$0x3] }
  0x30   :  { %v222_v8 = vpack.c.bf16 %v191_v63, %v189_v62  ;;  %v219_v9 = vpack.c.bf16 %v100_v3, %v98_v60  ;;  %v190_v10 = vmax.f32 %v186_v4, 0.0  ;;  %v853_v62 = vmov 1966171168  }
  0x31   :  { %264 = vmatprep.subr.bf16.mxu0 %v220_v5  ;;  %v162_v37 = vmul.f32 16.0, %v161_v35  ;;  %v466_v63 = vunpack.c.l.s4 %v853_v62  ;;  %v1008_v35 = vld [vmem:[%s1168_s4 + $0x1] ss:$4 sm:$0x3] }
  0x32   :  { %337 = vmatprep.subr.bf16.mxu1 %v222_v8  ;;  %265 = vmatpush1.bf16.msra.mxu0 %v219_v9  ;;  %v221_v12 = vpack.c.bf16 %v190_v10, %v188_v7 }
  0x33   :  { %v807_v39 = vadd.f32 -1.0, %v162_v37  ;;  %v467_v10 = vunpack.c.0.s8 %v466_v63 }
  0x34   :  { %338 = vmatpush1.bf16.msra.mxu1 %v221_v12 }
  0x35   :  { %812 = vmatmul.mubr.msk.bf16.vlgmr.msra.gmra.mrb[0].mxu0 %vm251_vm0, %v833_v11  ;;  %v164_v41 = vmul.f32 0.5, %v807_v39  ;;  %v1001_v31 = vsub.s32 %v467_v10, %v904_v16 }
  0x36   :  { %306 = vmatprep.mubr.bf16.mxu0 %v852_v0 }
  0x37   :  { %816 = vmatmul.mubr.msk.bf16.vlgmr.msra.gmra.mrb[0].mxu1 %vm251_vm0, %v833_v11  ;;  %v196_v2 = vrot.slane %v164_v41, %v911_v26  ;;  %v200_v43 = vrot.slane %v164_v41, %v908_v25 }
  0x38   :  { %379 = vmatprep.mubr.bf16.mxu1 %v852_v0 }
  0x39   :  { %v203_v48 = vsub.f32 %v914_v28, %v196_v2  ;;  %v204_v49 = vsub.f32 %v914_v28, %v200_v43  ;;  %v205_v50 = vsub.f32 %v916_v29, %v196_v2  ;;  %v206_v51 = vsub.f32 %v916_v29, %v200_v43 }
  0x3a   :  { %v640_v2 = vrot.slane %v998_v30, %v911_v26 }
  0x3b   :  { %v207_v56 = vand.u32 2147483647, %v203_v48  ;;  %v208_v57 = vand.u32 2147483647, %v204_v49  ;;  %v209_v58 = vand.u32 2147483647, %v205_v50  ;;  %v510_v50 = vrot.slane %v1008_v35, %v911_v26 }
  0x3c   :  { %v210_v59 = vand.u32 2147483647, %v206_v51 }
  0x3d   :  { %813 = vmatmul.mubr.msk.bf16.gmra.mrb[4].mxu0 %vm251_vm0, %v834_v13  ;;  %v211_v5 = vsub.f32 1.0, %v207_v56  ;;  %v213_v7 = vsub.f32 1.0, %v209_v58 }
  0x3e   :  { %316 = vmatprep.mubr.bf16.mxu0 %v852_v0  ;;  %v214_v8 = vsub.f32 1.0, %v210_v59 }
  0x3f   :  { %817 = vmatmul.mubr.msk.bf16.gmra.mrb[4].mxu1 %vm251_vm0, %v834_v13  ;;  %v984_v18 = vmax.f32 %v213_v7, 0.0 }
  0x40   :  { %389 = vmatprep.mubr.bf16.mxu1 %v852_v0 }
  0x45   :  { %814 = vmatmul.mubr.msk.bf16.gmra.mrb[8].mxu0 %vm251_vm0, %v835_v14 }
  0x46   :  { %326 = vmatprep.mubr.bf16.mxu0 %v852_v0 }
  0x47   :  { %818 = vmatmul.mubr.msk.bf16.gmra.mrb[8].mxu1 %vm251_vm0, %v835_v14  ;;  %v980_v14 = vmax.f32 %v211_v5, 0.0 }
  0x48   :  { %399 = vmatprep.mubr.bf16.mxu1 %v852_v0  ;;  %v61_v0 = vmul.f32 %v60_v17, %v892_v1 }
  0x4a   :  { %v64_v24 = vadd.f32 %v63_v21, %v61_v0  ;;  %v986_v0 = vmax.f32 %v214_v8, 0.0  ;;  %v991_v21 = vld [vmem:[%s1168_s4] ss:$4 sm:$0x3] }
  0x4b   :  { %v451_v16 = vrot.slane %v991_v21, %v911_v26 }
  0x4c   :  { %v66_v32 = vadd.f32 %v65_v27, %v64_v24 }
  0x4d   :  { %815 = vmatmul.mubr.msk.bf16.gmra.mrb[12].mxu0 %vm251_vm0, %v836_v15 }
  0x4e   :  { %v71_v34 = vadd.f32 1.0, %v66_v32 }
  0x4f   :  { %819 = vmatmul.mubr.msk.bf16.gmra.mrb[12].mxu1 %vm251_vm0, %v836_v15 }
  0x50   :  { %v72_v36 = vmul.f32 16.0, %v71_v34 }
  0x52   :  { %v799_v38 = vadd.f32 -1.0, %v72_v36 }
  0x54   :  { %v74_v40 = vmul.f32 0.5, %v799_v38 }
  0x56   :  { %v106_v42 = vrot.slane %v74_v40, %v911_v26  ;;  %v110_v1 = vrot.slane %v74_v40, %v908_v25  ;;  %v1017_v40 = vld [vmem:[%s1168_s4 + $0x9] ss:$4 sm:$0x3] }
  0x57   :  { %v696_v51 = vrot.slane %v1017_v40, %v911_v26  ;;  %v700_v56 = vrot.slane %v1017_v40, %v908_v25 }
  0x58   :  { %v113_v44 = vsub.f32 %v914_v28, %v106_v42  ;;  %v115_v45 = vsub.f32 %v916_v29, %v106_v42  ;;  %v114_v46 = vsub.f32 %v914_v28, %v110_v1  ;;  %v116_v47 = vsub.f32 %v916_v29, %v110_v1 }
  0x59   :  { %v212_v28 = vsub.f32 1.0, %v208_v57 }
  0x5a   :  { %v117_v52 = vand.u32 2147483647, %v113_v44  ;;  %v119_v53 = vand.u32 2147483647, %v115_v45  ;;  %v118_v54 = vand.u32 2147483647, %v114_v46  ;;  %v455_v45 = vrot.slane %v991_v21, %v908_v25 }
  0x5b   :  { %v120_v55 = vand.u32 2147483647, %v116_v47  ;;  %v982_v17 = vmax.f32 %v212_v28, 0.0  ;;  %v644_v46 = vrot.slane %v998_v30, %v908_v25 }
  0x5c   :  { %v121_v60 = vsub.f32 1.0, %v117_v52  ;;  %v123_v61 = vsub.f32 1.0, %v119_v53  ;;  %v122_v3 = vsub.f32 1.0, %v118_v54 }
  0x5d   :  { %v124_v4 = vsub.f32 1.0, %v120_v55  ;;  %v514_v55 = vrot.slane %v1008_v35, %v908_v25 }
  0x5e   :  { %v972_v9 = vmax.f32 %v121_v60, 0.0  ;;  %v974_v29 = vmax.f32 %v123_v61, 0.0  ;;  %v976_v12 = vmax.f32 %v122_v3, 0.0 }
  0x5f   :  { %v978_v13 = vmax.f32 %v124_v4, 0.0 }
 0x108   :  { %v298_v11 = vpop.f32.mrb[0].mxu0 }
 0x109   :  { %v300_v15 = vpop.f32.mrb[1].mxu0  ;;  %v410_v22 = vmul.f32 %v298_v11, %v972_v9 }
 0x10a   :  { %v371_v19 = vpop.f32.mrb[0].mxu1  ;;  %v302_v20 = vpop.f32.mrb[2].mxu0  ;;  %v411_v32 = vmul.f32 %v300_v15, %v976_v12 }
 0x10b   :  { %v373_v23 = vpop.f32.mrb[1].mxu1  ;;  %v412_v24 = vmul.f32 %v302_v20, %v974_v29  ;;  %v304_v27 = vpop.f32.mrb[3].mxu0  ;;  %v598_v36 = vmul.f32 %v371_v19, %v980_v14 }
 0x10c   :  { %v375_v33 = vpop.f32.mrb[2].mxu1  ;;  %v413_v34 = vmul.f32 %v304_v27, %v978_v13  ;;  %v599_v41 = vmul.f32 %v373_v23, %v982_v17 }
 0x10d   :  { %v414_v37 = vadd.f32 %v412_v24, %v410_v22  ;;  %v600_v38 = vmul.f32 %v375_v33, %v984_v18  ;;  %v377_v39 = vpop.f32.mrb[3].mxu1 }
 0x10e   :  { %v421_v42 = vadd.f32 %v413_v34, %v411_v32  ;;  %v601_v1 = vmul.f32 %v377_v39, %v986_v0 }
 0x10f   :  { %v415_v43 = vrot.slane %v414_v37, 4  ;;  %v602_v44 = vadd.f32 %v600_v38, %v598_v36 }
 0x110   :  { %v422_v47 = vrot.slane %v421_v42, 4  ;;  %v609_v48 = vadd.f32 %v601_v1, %v599_v41  ;;  %v308_v49 = vpop.f32.mrb[4].mxu0 }
 0x111   :  { %v416_v52 = vadd.f32 %v415_v43, %v414_v37  ;;  %v603_v53 = vrot.slane %v602_v44, 4  ;;  %v310_v54 = vpop.f32.mrb[5].mxu0  ;;  %v428_v59 = vmul.f32 %v308_v49, %v972_v9 }
 0x112   :  { %v423_v57 = vadd.f32 %v422_v47, %v421_v42  ;;  %v610_v58 = vrot.slane %v609_v48, 4  ;;  %v381_v60 = vpop.f32.mrb[4].mxu1  ;;  %v429_v61 = vmul.f32 %v310_v54, %v976_v12  ;;  %v312_v62 = vpop.f32.mrb[6].mxu0 }
 0x113   :  { %v417_v63 = vrot.slane %v416_v52, 2  ;;  %v604_v3 = vadd.f32 %v603_v53, %v602_v44  ;;  %v616_v4 = vmul.f32 %v381_v60, %v980_v14  ;;  %v383_v5 = vpop.f32.mrb[5].mxu1  ;;  %v430_v28 = vmul.f32 %v312_v62, %v974_v29  ;;  %v314_v7 = vpop.f32.mrb[7].mxu0 }
 0x114   :  { %v424_v8 = vrot.slane %v423_v57, 2  ;;  %v611_v10 = vadd.f32 %v610_v58, %v609_v48  ;;  %v617_v11 = vmul.f32 %v383_v5, %v982_v17  ;;  %v385_v15 = vpop.f32.mrb[6].mxu1  ;;  %v431_v19 = vmul.f32 %v314_v7, %v978_v13 }
 0x115   :  { %v418_v20 = vadd.f32 %v417_v63, %v416_v52  ;;  %v605_v22 = vrot.slane %v604_v3, 2  ;;  %v432_v23 = vadd.f32 %v430_v28, %v428_v59  ;;  %v618_v24 = vmul.f32 %v385_v15, %v984_v18  ;;  %v387_v27 = vpop.f32.mrb[7].mxu1 }
 0x116   :  { %v425_v32 = vadd.f32 %v424_v8, %v423_v57  ;;  %v612_v33 = vrot.slane %v611_v10, 2  ;;  %v439_v34 = vadd.f32 %v431_v19, %v429_v61  ;;  %v619_v36 = vmul.f32 %v387_v27, %v986_v0 }
 0x117   :  { %v419_v37 = vrot.slane %v418_v20, 1  ;;  %v606_v38 = vadd.f32 %v605_v22, %v604_v3  ;;  %v433_v39 = vrot.slane %v432_v23, 4  ;;  %v620_v41 = vadd.f32 %v618_v24, %v616_v4 }
 0x118   :  { %v426_v42 = vrot.slane %v425_v32, 1  ;;  %v613_v1 = vadd.f32 %v612_v33, %v611_v10  ;;  %v440_v43 = vrot.slane %v439_v34, 4  ;;  %v627_v44 = vadd.f32 %v619_v36, %v617_v11  ;;  %v318_v47 = vpop.f32.mrb[8].mxu0 }
 0x119   :  { %v1043_v48 = vadd.f32 %v419_v37, %v418_v20  ;;  %v607_v49 = vrot.slane %v606_v38, 1  ;;  %v434_v52 = vadd.f32 %v433_v39, %v432_v23  ;;  %v621_v53 = vrot.slane %v620_v41, 4  ;;  %v320_v54 = vpop.f32.mrb[9].mxu0 }
 0x11a   :  { %v1045_v57 = vadd.f32 %v426_v42, %v425_v32  ;;  %v614_v58 = vrot.slane %v613_v1, 1  ;;  %v441_v59 = vadd.f32 %v440_v43, %v439_v34  ;;  %v628_v60 = vrot.slane %v627_v44, 4  ;;  %v391_v61 = vpop.f32.mrb[8].mxu1  ;;  %v322_v62 = vpop.f32.mrb[10].mxu0 }
 0x11b   :  { %v1047_v63 = vadd.f32 %v607_v49, %v606_v38  ;;  %v435_v3 = vrot.slane %v434_v52, 2  ;;  %v622_v4 = vadd.f32 %v621_v53, %v620_v41  ;;  %v486_v5 = vmul.f32 %v318_v47, %v972_v9  ;;  %v393_v28 = vpop.f32.mrb[9].mxu1  ;;  %v324_v7 = vpop.f32.mrb[11].mxu0 }
 0x11c   :  { %v1050_v8 = vadd.f32 %v614_v58, %v613_v1  ;;  %v442_v10 = vrot.slane %v441_v59, 2  ;;  %v629_v11 = vadd.f32 %v628_v60, %v627_v44  ;;  %v672_v15 = vmul.f32 %v391_v61, %v980_v14  ;;  %v395_v19 = vpop.f32.mrb[10].mxu1 }
 0x11d   :  { %v436_v20 = vadd.f32 %v435_v3, %v434_v52  ;;  %v623_v22 = vrot.slane %v622_v4, 2  ;;  %v487_v23 = vmul.f32 %v320_v54, %v976_v12  ;;  %v673_v24 = vmul.f32 %v393_v28, %v982_v17  ;;  %v397_v27 = vpop.f32.mrb[11].mxu1 }
 0x11e   :  { %v443_v32 = vadd.f32 %v442_v10, %v441_v59  ;;  %v630_v33 = vrot.slane %v629_v11, 2  ;;  %v488_v34 = vmul.f32 %v322_v62, %v974_v29  ;;  %v674_v36 = vmul.f32 %v395_v19, %v984_v18 }
 0x11f   :  { %v437_v37 = vrot.slane %v436_v20, 1  ;;  %v624_v38 = vadd.f32 %v623_v22, %v622_v4  ;;  %v489_v39 = vmul.f32 %v324_v7, %v978_v13  ;;  %v675_v41 = vmul.f32 %v397_v27, %v986_v0 }
 0x120   :  { %v444_v42 = vrot.slane %v443_v32, 1  ;;  %v631_v1 = vadd.f32 %v630_v33, %v629_v11  ;;  %v490_v43 = vadd.f32 %v488_v34, %v486_v5  ;;  %v676_v44 = vadd.f32 %v674_v36, %v672_v15  ;;  %v328_v47 = vpop.f32.mrb[12].mxu0 }
 0x121   :  { %v438_v49 = vadd.f32 %v437_v37, %v436_v20  ;;  %v625_v52 = vrot.slane %v624_v38, 1  ;;  %v497_v53 = vadd.f32 %v489_v39, %v487_v23  ;;  %v683_v54 = vadd.f32 %v675_v41, %v673_v24  ;;  %v330_v58 = vpop.f32.mrb[13].mxu0 }
 0x122   :  { %v445_v59 = vadd.f32 %v444_v42, %v443_v32  ;;  %v632_v60 = vrot.slane %v631_v1, 1  ;;  %v491_v61 = vrot.slane %v490_v43, 4  ;;  %v677_v62 = vrot.slane %v676_v44, 4  ;;  %v401_v3 = vpop.f32.mrb[12].mxu1  ;;  %v332_v4 = vpop.f32.mrb[14].mxu0 }
 0x123   :  { %v458_v28 = vsub.f32 %v438_v49, %v451_v16  ;;  %v626_v7 = vadd.f32 %v625_v52, %v624_v38  ;;  %v498_v10 = vrot.slane %v497_v53, 4  ;;  %v684_v5 = vrot.slane %v683_v54, 4  ;;  %v403_v11 = vpop.f32.mrb[13].mxu1  ;;  %v334_v15 = vpop.f32.mrb[15].mxu0 }
 0x124   :  { %v459_v19 = vsub.f32 %v445_v59, %v455_v45  ;;  %v633_v20 = vadd.f32 %v632_v60, %v631_v1  ;;  %v492_v22 = vadd.f32 %v491_v61, %v490_v43  ;;  %v678_v23 = vadd.f32 %v677_v62, %v676_v44  ;;  %v405_v24 = vpop.f32.mrb[14].mxu1 }
 0x125   :  { %v460_v27 = vmul.f32 %v458_v28, %v1043_v48  ;;  %v647_v32 = vsub.f32 %v626_v7, %v640_v2  ;;  %v499_v16 = vadd.f32 %v498_v10, %v497_v53  ;;  %v685_v33 = vadd.f32 %v684_v5, %v683_v54  ;;  %v407_v34 = vpop.f32.mrb[15].mxu1 }
 0x126   :  { %v461_v36 = vmul.f32 %v459_v19, %v1045_v57  ;;  %v648_v37 = vsub.f32 %v633_v20, %v644_v46  ;;  %v493_v45 = vrot.slane %v492_v22, 2  ;;  %v679_v38 = vrot.slane %v678_v23, 2 }
 0x127   :  { %v649_v39 = vmul.f32 %v647_v32, %v1047_v63  ;;  %v500_v42 = vrot.slane %v499_v16, 2  ;;  %v686_v2 = vrot.slane %v685_v33, 2  ;;  %v542_v46 = vmul.f32 %v328_v47, %v972_v9 }
 0x128   :  { %v464_v1 = vcombine.low %v460_v27, %v461_v36  ;;  %v650_v43 = vmul.f32 %v648_v37, %v1050_v8  ;;  %v494_v44 = vadd.f32 %v493_v45, %v492_v22  ;;  %v680_v49 = vadd.f32 %v679_v38, %v678_v23 }
 0x129   :  { %v501_v52 = vadd.f32 %v500_v42, %v499_v16  ;;  %v687_v53 = vadd.f32 %v686_v2, %v685_v33  ;;  %v728_v54 = vmul.f32 %v401_v3, %v980_v14  ;;  %v543_v7 = vmul.f32 %v330_v58, %v976_v12 }
 0x12a   :  { %v471_v59 = vrot.slane %v464_v1, %v1001_v31  ;;  %v653_v60 = vcombine.low %v649_v39, %v650_v43  ;;  %v495_v6 = vrot.slane %v494_v44, 1  ;;  %v681_v61 = vrot.slane %v680_v49, 1 }
 0x12b   :  { %v502_v62 = vrot.slane %v501_v52, 1  ;;  %v688_v28 = vrot.slane %v687_v53, 1  ;;  %v544_v10 = vmul.f32 %v332_v4, %v974_v29  ;;  %v730_v3 = vmul.f32 %v405_v24, %v984_v18 }
 0x12c   :  { %v478_v5 = vrot.slane %v471_v59, %v1001_v31  ;;  %v660_v19 = vrot.slane %v653_v60, %v1001_v31  ;;  %v496_v20 = vadd.f32 %v495_v6, %v494_v44  ;;  %v682_v22 = vadd.f32 %v681_v61, %v680_v49 }
 0x12d   :  { %v503_v9 = vadd.f32 %v502_v62, %v501_v52  ;;  %v689_v47 = vadd.f32 %v688_v28, %v687_v53  ;;  %v546_v14 = vadd.f32 %v544_v10, %v542_v46  ;;  %v731_v37 = vmul.f32 %v407_v34, %v986_v0 }
 0x12e   :  { %v480_v23 = vadd.f32 %v478_v5, %v991_v21  ;;  %v667_v27 = vrot.slane %v660_v19, %v1001_v31  ;;  %v517_v12 = vsub.f32 %v496_v20, %v510_v50  ;;  %v703_v29 = vsub.f32 %v682_v22, %v696_v51 }
 0x12f   :  { %v518_v58 = vsub.f32 %v503_v9, %v514_v55  ;;  %v704_v18 = vsub.f32 %v689_v47, %v700_v56  ;;  %v547_v4 = vrot.slane %v546_v14, 4  ;;  %v732_v21 = vadd.f32 %v730_v3, %v728_v54 }
 0x130   :  { %485 = vst.msk [vmem:[%s1169_s5] ss:$4 sm:$0x3] %vm1075_vm1, %v480_v23  ;;  %v669_v50 = vadd.f32 %v998_v30, %v667_v27  ;;  %v519_v51 = vmul.f32 %v517_v12, %v1043_v48  ;;  %v705_v24 = vmul.f32 %v703_v29, %v1047_v63  ;;  %v545_v55 = vmul.f32 %v334_v15, %v978_v13  ;;  %v822_v15 = vld [vmem:[%s1168_s4 + $0x2] ss:$4 sm:$0x3] }
 0x131   :  { %v520_v32 = vmul.f32 %v518_v58, %v1045_v57  ;;  %v706_v56 = vmul.f32 %v704_v18, %v1050_v8  ;;  %v548_v16 = vadd.f32 %v547_v4, %v546_v14  ;;  %v733_v33 = vrot.slane %v732_v21, 4 }
 0x132   :  { %825 = vst.msk [vmem:[%s1169_s5 + $0x8] ss:$4 sm:$0x3] %vm1075_vm1, %v669_v50  ;;  %v729_v30 = vmul.f32 %v403_v11, %v982_v17  ;;  %v553_v36 = vadd.f32 %v545_v55, %v543_v7  ;;  %v828_v17 = vld [vmem:[%s1168_s4 + $0xa] ss:$4 sm:$0x3]  ;;  %v566_v0 = vrot.slane %v822_v15, %v911_v26 }
 0x133   :  { %v523_v45 = vcombine.low %v519_v51, %v520_v32  ;;  %v709_v38 = vcombine.low %v705_v24, %v706_v56  ;;  %v549_v13 = vrot.slane %v548_v16, 2  ;;  %v734_v39 = vadd.f32 %v733_v33, %v732_v21 }
 0x134   :  { %v554_v42 = vrot.slane %v553_v36, 4  ;;  %v739_v2 = vadd.f32 %v731_v37, %v729_v30  ;;  %v752_v59 = vrot.slane %v828_v17, %v911_v26  ;;  %v756_v3 = vrot.slane %v828_v17, %v908_v25 }
 0x135   :  { %v530_v1 = vrot.slane %v523_v45, %v1001_v31  ;;  %v716_v43 = vrot.slane %v709_v38, %v1001_v31  ;;  %v550_v44 = vadd.f32 %v549_v13, %v548_v16  ;;  %v735_v49 = vrot.slane %v734_v39, 2 }
 0x136   :  { %v555_v11 = vadd.f32 %v554_v42, %v553_v36  ;;  %v740_v34 = vrot.slane %v739_v2, 4 }
 0x137   :  { %v537_v52 = vrot.slane %v530_v1, %v1001_v31  ;;  %v723_v53 = vrot.slane %v716_v43, %v1001_v31  ;;  %v551_v46 = vrot.slane %v550_v44, 1  ;;  %v736_v54 = vadd.f32 %v735_v49, %v734_v39 }
 0x138   :  { %v556_v60 = vrot.slane %v555_v11, 2  ;;  %v741_v6 = vadd.f32 %v740_v34, %v739_v2 }
 0x139   :  { %v539_v61 = vadd.f32 %v1008_v35, %v537_v52  ;;  %v725_v62 = vadd.f32 %v1017_v40, %v723_v53  ;;  %v552_v28 = vadd.f32 %v551_v46, %v550_v44  ;;  %v737_v7 = vrot.slane %v736_v54, 1 }
 0x13a   :  { %v557_v10 = vadd.f32 %v556_v60, %v555_v11  ;;  %v742_v5 = vrot.slane %v741_v6, 2  ;;  %v570_v40 = vrot.slane %v822_v15, %v908_v25 }
 0x13b   :  { %821 = vst.msk [vmem:[%s1169_s5 + $0x1] ss:$4 sm:$0x3] %vm1075_vm1, %v539_v61  ;;  %827 = vst.msk [vmem:[%s1169_s5 + $0x9] ss:$4 sm:$0x3] %vm1075_vm1, %v725_v62  ;;  %v573_v26 = vsub.f32 %v552_v28, %v566_v0  ;;  %v738_v35 = vadd.f32 %v737_v7, %v736_v54 }
 0x13c   :  { %v558_v19 = vrot.slane %v557_v10, 1  ;;  %v743_v20 = vadd.f32 %v742_v5, %v741_v6 }
 0x13d   :  { %v575_v22 = vmul.f32 %v573_v26, %v1043_v48  ;;  %v759_v9 = vsub.f32 %v738_v35, %v752_v59 }
 0x13e   :  { %v559_v47 = vadd.f32 %v558_v19, %v557_v10  ;;  %v744_v14 = vrot.slane %v743_v20, 1 }
 0x13f   :  { %v761_v23 = vmul.f32 %v759_v9, %v1047_v63 }
 0x140   :  { %v574_v27 = vsub.f32 %v559_v47, %v570_v40  ;;  %v745_v12 = vadd.f32 %v744_v14, %v743_v20 }
 0x142   :  { %v576_v29 = vmul.f32 %v574_v27, %v1045_v57  ;;  %v760_v58 = vsub.f32 %v745_v12, %v756_v3 }
 0x144   :  { %v579_v18 = vcombine.low %v575_v22, %v576_v29  ;;  %v762_v4 = vmul.f32 %v760_v58, %v1050_v8 }
 0x146   :  { %v586_v21 = vrot.slane %v579_v18, %v1001_v31  ;;  %v765_v50 = vcombine.low %v761_v23, %v762_v4 }
 0x148   :  { %v593_v48 = vrot.slane %v586_v21, %v1001_v31  ;;  %v772_v51 = vrot.slane %v765_v50, %v1001_v31 }
 0x14a   :  { %v595_v24 = vadd.f32 %v822_v15, %v593_v48  ;;  %v779_v25 = vrot.slane %v772_v51, %v1001_v31 }
 0x14c   :  { %823 = vst.msk [vmem:[%s1169_s5 + $0x2] ss:$4 sm:$0x3] %vm1075_vm1, %v595_v24  ;;  %v781_v57 = vadd.f32 %v828_v17, %v779_v25 }
 0x14e   :  { %829 = vst.msk [vmem:[%s1169_s5 + $0xa] ss:$4 sm:$0x3] %vm1075_vm1, %v781_v57 }
 0x14f   :  { %788 = vsyncpa [#allocation3], 1 }

</bundles_post_ra>
